<compile_context>
chip_gen: v6e
topology: v6e:2x2x1
jax: 0.10.0
libtpu: 0.0.40
codegen_flags: <defaults>
</compile_context>

<pallas_src>
import functools

import jax
import jax.numpy as jnp
from jax.experimental import pallas as pl
from jax.experimental.pallas import tpu as pltpu

_BIAS_LANES = 128  # lane-pad each bias row so every per-layer slice starts at lane 0


# ----------------------------------------------------------------------------
# Fused Pallas kernel: (channel mean) -> [Linear / ReLU]* prefix
# ----------------------------------------------------------------------------
def _fused_mlp_kernel(*refs, ops, num_linears, channel_mean):
    # refs = (x_ref, w_0, ..., w_{L-1}, b_all_ref, o_ref)
    #   x_ref : [B, C, H*W] if channel_mean else [B, F]
    #   w_i   : [in_i, out_i]       (== torch weight.T)
    #   b_all : [L, 128] lane-padded biases (row i = bias of linear i)
    #   o_ref : [B, out_last]
    x_ref = refs[0]
    w_refs = refs[1:1 + num_linears]
    b_ref = refs[1 + num_linears]
    o_ref = refs[-1]

    x = x_ref[...].astype(jnp.float32)
    if channel_mean:
        # mean over the channel (sublane) axis: [B, C, HW] -> [B, HW]
        x = jnp.mean(x, axis=1)

    b_all = b_ref[...]  # loaded once, sliced statically per layer

    li = 0
    for kind in ops:  # static Python loop -> fully unrolled at trace time
        if kind == "linear":
            w = w_refs[li][...]
            n = w.shape[1]
            x = jnp.dot(x, w, preferred_element_type=jnp.float32)
            x = x + b_all[li:li + 1, :n]  # [B, n] + [1, n]
            li += 1
        elif kind == "relu":
            x = jnp.maximum(x, 0.0)
        else:
            raise ValueError(kind)

    o_ref[...] = x.astype(o_ref.dtype)


def fused_mlp_prefix(x_in, lin_params, ops, channel_mean, out_dtype):
    """One pallas_call running the whole prefix. Everything is a single
    full-array VMEM block (total weights+activations ~40 KiB)."""
    B = x_in.shape[0]
    num_linears = len(lin_params)
    ws = [w for (w, _) in lin_params]
    out_dim = ws[-1].shape[1]

    # Pack all biases into one lane-padded block.
    b_all = jnp.zeros((num_linears, _BIAS_LANES), dtype=jnp.float32)
    for i, (_, b) in enumerate(lin_params):
        b_all = b_all.at[i, : b.shape[-1]].set(b.reshape(-1).astype(jnp.float32))

    kernel = functools.partial(
        _fused_mlp_kernel,
        ops=tuple(ops),
        num_linears=num_linears,
        channel_mean=channel_mean,
    )

    x_spec = pl.BlockSpec(x_in.shape, lambda: (0,) * x_in.ndim)
    w_specs = [pl.BlockSpec(w.shape, lambda: (0, 0)) for w in ws]
    b_spec = pl.BlockSpec(b_all.shape, lambda: (0, 0))

    return pl.pallas_call(
        kernel,
        out_shape=jax.ShapeDtypeStruct((B, out_dim), out_dtype),
        in_specs=[x_spec] + w_specs + [b_spec],
        out_specs=pl.BlockSpec((B, out_dim), lambda: (0, 0)),
        compiler_params=pltpu.CompilerParams(vmem_limit_bytes=32 * 1024 * 1024),
    )(x_in, *ws, b_all)


# ----------------------------------------------------------------------------
# Deterministic "model.layers" construction (synthetic, no checkpoint load)
# ----------------------------------------------------------------------------
def build_mlp_layers(key, in_features, hidden, out_features, dtype=jnp.float32):
    """List of layer descriptors mirroring
    nn.Sequential(Linear, ReLU, Linear, ReLU, Linear)."""
    dims = [(in_features, hidden), (hidden, hidden), (hidden, out_features)]
    layers = []
    for (fan_in, fan_out) in dims:
        key, kw, kb = jax.random.split(key, 3)
        bound = 1.0 / jnp.sqrt(jnp.float32(fan_in))
        # stored as [in, out] == torch weight.T
        w = jax.random.uniform(kw, (fan_in, fan_out), dtype, -bound, bound)
        b = jax.random.uniform(kb, (1, fan_out), dtype, -bound, bound)
        layers.append(("linear", (w, b)))
        layers.append(("relu", None))
    layers.pop()  # final Linear has no trailing ReLU
    return layers


# ----------------------------------------------------------------------------
# MLPSubnet.forward equivalent
# ----------------------------------------------------------------------------
def mlp_subnet_forward(x, layers, layer_i):
    prefix = layers[: layer_i + 1]
    B = x.shape[0]
    channel_mean = (x.ndim >= 2 and x.shape[1] == 3)

    ops = [kind for kind, _ in prefix]
    lin_params = [params for kind, params in prefix if kind == "linear"]

    if not lin_params:
        # Degenerate prefix with no Linear: nothing worth a kernel.
        out = jnp.mean(x, axis=1, keepdims=True) if channel_mean else x
        out = out.reshape(B, -1)
        for _ in ops:
            out = jnp.maximum(out, 0.0)
        return out

    if channel_mean:
        x_in = x.reshape(B, x.shape[1], -1)   # [B, 3, H*W]; mean folded into kernel
    else:
        x_in = x.reshape(B, -1)               # [B, C*H*W]

    return fused_mlp_prefix(x_in, lin_params, ops, channel_mean, x.dtype)


if __name__ == "__main__":
    key = jax.random.PRNGKey(0)
    k_x, k_params = jax.random.split(key)

    # NCHW image, 3 channels so the channel-mean branch triggers.
    B, C, H, W = 2, 3, 16, 16
    x = jax.random.normal(k_x, (B, C, H, W), dtype=jnp.float32)

    in_features = H * W  # after mean(1) + flatten: [B, 256]
    hidden, out_features = 32, 10
    layers = build_mlp_layers(k_params, in_features, hidden, out_features)

    layer_i = 3  # layers[:4] = Linear -> ReLU -> Linear -> ReLU

    y = mlp_subnet_forward(x, layers, layer_i)
    y = jax.block_until_ready(y)

    # Pure-JAX reference of the same prefix.
    x_ref = jnp.mean(x, axis=1, keepdims=True).reshape(B, -1)
    (w0, b0) = layers[0][1]
    (w1, b1) = layers[2][1]
    ref = jnp.maximum(x_ref @ w0 + b0, 0.0)
    ref = jnp.maximum(ref @ w1 + b1, 0.0)
    assert y.shape == (B, hidden), y.shape
    assert jnp.allclose(y, ref, atol=1e-5, rtol=1e-5)

    print("KERNEL_OK")
</pallas_src>

<mosaic_0001>
module attributes {stable_mosaic.version = 11 : i64} {
  func.func @_fused_mlp_kernel(%arg0: memref<2x3x256xf32, #tpu.memory_space<vmem>>, %arg1: memref<256x32xf32, #tpu.memory_space<vmem>>, %arg2: memref<32x32xf32, #tpu.memory_space<vmem>>, %arg3: memref<2x128xf32, #tpu.memory_space<vmem>>, %arg4: memref<2x32xf32, #tpu.memory_space<vmem>>) attributes {dimension_semantics = [], scalar_prefetch = 0 : i64, scratch_operands = 0 : i64, tpu.core_type = #tpu.core_type<tc>} {
    %c0 = arith.constant 0 : index
    %c0_0 = arith.constant 0 : index
    %c0_1 = arith.constant 0 : index
    %0 = vector.load %arg0[%c0, %c0_0, %c0_1] : memref<2x3x256xf32, #tpu.memory_space<vmem>>, vector<2x3x256xf32>
    %cst = arith.constant dense<0.000000e+00> : vector<2x256xf32>
    %1 = vector.multi_reduction <add>, %0, %cst [1] : vector<2x3x256xf32> to vector<2x256xf32>
    %cst_2 = arith.constant 3.000000e+00 : f32
    %2 = vector.broadcast %cst_2 : f32 to vector<2x256xf32>
    %3 = arith.divf %1, %2 : vector<2x256xf32>
    %c0_3 = arith.constant 0 : index
    %c0_4 = arith.constant 0 : index
    %4 = vector.load %arg3[%c0_3, %c0_4] : memref<2x128xf32, #tpu.memory_space<vmem>>, vector<2x128xf32>
    %c0_5 = arith.constant 0 : index
    %c0_6 = arith.constant 0 : index
    %5 = vector.load %arg1[%c0_5, %c0_6] : memref<256x32xf32, #tpu.memory_space<vmem>>, vector<256x32xf32>
    %cst_7 = arith.constant dense<0.000000e+00> : vector<2x32xf32>
    %6 = tpu.matmul %3, %5, %cst_7 {dimension_numbers = #tpu.dot_dimension_numbers<[1], [0], [0], [1], [0, 0, 1, 1], [], []>} : vector<2x256xf32>, vector<256x32xf32>, vector<2x32xf32> -> vector<2x32xf32>
    %7 = vector.extract_strided_slice %4 {offsets = [0, 0], sizes = [1, 32], strides = [1, 1]} : vector<2x128xf32> to vector<1x32xf32>
    %8 = vector.broadcast %7 : vector<1x32xf32> to vector<2x32xf32>
    %9 = arith.addf %6, %8 : vector<2x32xf32>
    %cst_8 = arith.constant 0.000000e+00 : f32
    %10 = vector.broadcast %cst_8 : f32 to vector<2x32xf32>
    %11 = arith.maximumf %9, %10 : vector<2x32xf32>
    %c0_9 = arith.constant 0 : index
    %c0_10 = arith.constant 0 : index
    %12 = vector.load %arg2[%c0_9, %c0_10] : memref<32x32xf32, #tpu.memory_space<vmem>>, vector<32x32xf32>
    %cst_11 = arith.constant dense<0.000000e+00> : vector<2x32xf32>
    %13 = tpu.matmul %11, %12, %cst_11 {dimension_numbers = #tpu.dot_dimension_numbers<[1], [0], [0], [1], [0, 0, 1, 1], [], []>} : vector<2x32xf32>, vector<32x32xf32>, vector<2x32xf32> -> vector<2x32xf32>
    %14 = vector.extract_strided_slice %4 {offsets = [1, 0], sizes = [1, 32], strides = [1, 1]} : vector<2x128xf32> to vector<1x32xf32>
    %15 = vector.broadcast %14 : vector<1x32xf32> to vector<2x32xf32>
    %16 = arith.addf %13, %15 : vector<2x32xf32>
    %cst_12 = arith.constant 0.000000e+00 : f32
    %17 = vector.broadcast %cst_12 : f32 to vector<2x32xf32>
    %18 = arith.maximumf %16, %17 : vector<2x32xf32>
    %c0_13 = arith.constant 0 : index
    %c0_14 = arith.constant 0 : index
    %19 = vector.load %arg4[%c0_13, %c0_14] : memref<2x32xf32, #tpu.memory_space<vmem>>, vector<2x32xf32>
    tpu.vector_store %arg4[%c0_13, %c0_14], %18 {strides = array<i32>} : memref<2x32xf32, #tpu.memory_space<vmem>>, vector<2x32xf32>,
    return
  }
}

</mosaic_0001>

<bundles_post_ra>
// kernel: tpu_custom_call.1
= control target key start
LH: loop header
LB: loop body
LE: loop exit
PB: predicated region body
PF: predicated region fallthrough
CT: control target
= control target key end

     0   :  { %vm26_vm0 = vcmask 1042432   ;;  %s507_s0 = inlined_call_operand.vmem [shape: f32[2,3,256], index: 0, kind: input, shape index: {}]   ;;  %s508_s1 = inlined_call_operand.vmem [shape: f32[256,32], index: 1, kind: input, shape index: {}]   ;;  %s509_s2 = inlined_call_operand.vmem [shape: f32[32,32], index: 2, kind: input, shape index: {}]   ;;  %s510_s3 = inlined_call_operand.vmem [shape: f32[2,128], index: 3, kind: input, shape index: {}]   ;;  %s511_s4 = inlined_call_operand.hbm [shape: f32[2,32], index: 4, kind: output, shape index: {}]  }
   0x1   :  { %v92_v0 = vld [vmem:[%s508_s1 + $0xf8] sm:$0xff]  ;;  %v91_v2 = vld [vmem:[%s508_s1 + $0xf0] sm:$0xff]  ;;  %v90_v4 = vld [vmem:[%s508_s1 + $0xe8] sm:$0xff] }
   0x2   :  { %v76_v1 = vld [vmem:[%s508_s1 + $0x78] sm:$0xff]  ;;  %277 = vmatprep.subr.mxu0 %v92_v0  ;;  %v75_v3 = vld [vmem:[%s508_s1 + $0x70] sm:$0xff]  ;;  %v74_v5 = vld [vmem:[%s508_s1 + $0x68] sm:$0xff] }
   0x3   :  { %278 = vmatpush3.msra.mxu0 %v76_v1  ;;  %v89_v6 = vld [vmem:[%s508_s1 + $0xe0] sm:$0xff]  ;;  %v88_v8 = vld [vmem:[%s508_s1 + $0xd8] sm:$0xff]  ;;  %v87_v10 = vld [vmem:[%s508_s1 + $0xd0] sm:$0xff] }
   0x4   :  { %279 = vmatprep.subr.mxu0 %v91_v2  ;;  %v73_v7 = vld [vmem:[%s508_s1 + $0x60] sm:$0xff]  ;;  %v72_v9 = vld [vmem:[%s508_s1 + $0x58] sm:$0xff]  ;;  %v71_v11 = vld [vmem:[%s508_s1 + $0x50] sm:$0xff] }
   0x5   :  { %280 = vmatpush3.msra.mxu0 %v75_v3  ;;  %v86_v12 = vld [vmem:[%s508_s1 + $0xc8] sm:$0xff]  ;;  %v18_v13 = vld [vmem:[%s507_s0] sm:$0x77] }
   0x6   :  { %281 = vmatprep.subr.mxu0 %v90_v4  ;;  %v70_v14 = vld [vmem:[%s508_s1 + $0x48] sm:$0xff]  ;;  %v22_v16 = vcombine.high %v18_v13, %v18_v13  ;;  %v27_v17 = vsel %vm26_vm0, %v18_v13, 0.0 }
   0x7   :  { %282 = vmatpush3.msra.mxu0 %v74_v5  ;;  %v19_v15 = vld [vmem:[%s507_s0 + $0x8] sm:$0x77] }
   0x8   :  { %283 = vmatprep.subr.mxu0 %v89_v6 }
   0x9   :  { %284 = vmatpush3.msra.mxu0 %v73_v7 }
   0xa   :  { %285 = vmatprep.subr.mxu0 %v88_v8 }
   0xb   :  { %286 = vmatpush3.msra.mxu0 %v72_v9 }
   0xc   :  { %287 = vmatprep.subr.mxu0 %v87_v10 }
   0xd   :  { %9 = vsyncpa [#allocation3], 0  ;;  %288 = vmatpush3.msra.mxu0 %v71_v11  ;;  %v85_v18 = vld [vmem:[%s508_s1 + $0xc0] sm:$0xff]  ;;  %v23_v19 = vcombine.high %v19_v15, %v19_v15  ;;  %v28_v20 = vrot.slane %v27_v17, 4  ;;  %v41_v21 = vsel %vm26_vm0, %v19_v15, 0.0  ;;  %v34_v23 = vsel %vm26_vm0, %v22_v16, 0.0 }
   0xe   :  { %289 = vmatprep.subr.mxu0 %v86_v12  ;;  %v69_v22 = vld [vmem:[%s508_s1 + $0x40] sm:$0xff]  ;;  %v42_v24 = vrot.slane %v41_v21, 4  ;;  %v84_v25 = vld [vmem:[%s508_s1 + $0xb8] sm:$0xff]  ;;  %v35_v26 = vrot.slane %v34_v23, 4  ;;  %v83_v32 = vld [vmem:[%s508_s1 + $0xb0] sm:$0xff]  ;;  %vm101_vm1 = vcmask 1041409   ;;  %v93_v8 = vlaneseq }
   0xf   :  { %290 = vmatpush3.msra.mxu0 %v70_v14  ;;  %v48_v27 = vsel %vm26_vm0, %v23_v19, 0.0  ;;  %v29_v28 = vadd.f32 %v28_v20, %v27_v17  ;;  %v68_v29 = vld [vmem:[%s508_s1 + $0x38] sm:$0xff]  ;;  %v67_v35 = vld [vmem:[%s508_s1 + $0x30] sm:$0xff]  ;;  %v82_v38 = vld [vmem:[%s508_s1 + $0xa8] sm:$0xff]  ;;  %v355_v6 = vmov 0.0   ;;  %vm356_vm2 = vmmov 0  }
  0x10   :  { %291 = vmatprep.subr.mxu0 %v85_v18  ;;  %v49_v30 = vrot.slane %v48_v27, 4  ;;  %v43_v31 = vadd.f32 %v42_v24, %v41_v21  ;;  %v36_v33 = vadd.f32 %v35_v26, %v34_v23  ;;  %v66_v41 = vld [vmem:[%s508_s1 + $0x28] sm:$0xff]  ;;  %v81_v44 = vld [vmem:[%s508_s1 + $0xa0] sm:$0xff]  ;;  %v80_v50 = vld [vmem:[%s508_s1 + $0x98] sm:$0xff]  ;;  %317 = vmatprep.subr.mxu1 %v355_v6  ;;  %v94_v11 = vshrl.u32 %v93_v8, 7 }
  0x11   :  { %292 = vmatpush3.msra.mxu0 %v69_v22  ;;  %v30_v34 = vrot.slane %v29_v28, 2  ;;  %v65_v47 = vld [vmem:[%s508_s1 + $0x20] sm:$0xff]  ;;  %v64_v53 = vld [vmem:[%s508_s1 + $0x18] sm:$0xff]  ;;  %v79_v56 = vld [vmem:[%s508_s1 + $0x90] sm:$0xff]  ;;  %325 = vmatprep.mubr.msk.f32.mxu1 %vm356_vm2, %v355_v6  ;;  %vm185_vm3 = vcmask 261120   ;;  %vm260_vm4 = vcmask 254976  }
  0x12   :  { %293 = vmatprep.subr.mxu0 %v84_v25  ;;  %v50_v36 = vadd.f32 %v49_v30, %v48_v27  ;;  %v44_v37 = vrot.slane %v43_v31, 2  ;;  %v37_v39 = vrot.slane %v36_v33, 2  ;;  %v63_v58 = vld [vmem:[%s508_s1 + $0x10] sm:$0xff]  ;;  %v78_v59 = vld [vmem:[%s508_s1 + $0x88] sm:$0xff]  ;;  %v77_v2 = vld [vmem:[%s508_s1 + $0x80] sm:$0xff]  ;;  %v183_v13 = vsub.s32 1, %v94_v11 }
  0x13   :  { %294 = vmatpush3.msra.mxu0 %v68_v29  ;;  %v31_v40 = vadd.f32 %v30_v34, %v29_v28  ;;  %v62_v0 = vld [vmem:[%s508_s1 + $0x8] sm:$0xff]  ;;  %v61_v3 = vld [vmem:[%s508_s1] sm:$0xff]  ;;  %v180_v7 = vld [vmem:[%s509_s2 + $0x18] sm:$0xff]  ;;  %v95_v16 = vsub.s32 0, %v94_v11 }
  0x14   :  { %295 = vmatprep.subr.mxu0 %v83_v32  ;;  %v51_v42 = vrot.slane %v50_v36, 2  ;;  %v45_v43 = vadd.f32 %v44_v37, %v43_v31  ;;  %v38_v45 = vadd.f32 %v37_v39, %v36_v33  ;;  %318 = vmatpush3.msra.mxu1 %v180_v7  ;;  %v179_v9 = vld [vmem:[%s509_s2 + $0x10] sm:$0xff]  ;;  %v178_v10 = vld [vmem:[%s509_s2 + $0x8] sm:$0xff]  ;;  %v177_v12 = vld [vmem:[%s509_s2] sm:$0xff]  ;;  %s357_s2 = smov [#allocation2]  }
  0x15   :  { %296 = vmatpush3.msra.mxu0 %v67_v35  ;;  %v32_v46 = vrot.slane %v31_v40, 1  ;;  %319 = vmatprep.subr.mxu1 %v355_v6  ;;  %v60_v14 = vld [vmem:[%s510_s3] sm:$0x3]  ;;  %s268_s12 = sshll.u32 %s357_s2, 4  ;;  %s269_s12 = int_to_ptr.vmem [resolvable:$true] %s268_s12 }
  0x16   :  { %297 = vmatprep.subr.mxu0 %v82_v38  ;;  %v52_v48 = vadd.f32 %v51_v42, %v50_v36  ;;  %v46_v49 = vrot.slane %v45_v43, 1  ;;  %v39_v51 = vrot.slane %v38_v45, 1  ;;  %320 = vmatpush3.msra.mxu1 %v179_v9  ;;  %v184_v15 = vrot.slane %v60_v14, %v183_v13  ;;  %s333_s3 = scalar_lea.vmem %s269_s12, 32  ;;  %p338_p1 = scmp.lt.s32.totalorder %s269_s12, %s269_s12 }
  0x17   :  { %298 = vmatpush3.msra.mxu0 %v66_v41  ;;  %v33_v52 = vadd.f32 %v32_v46, %v31_v40  ;;  %321 = vmatprep.subr.mxu1 %v355_v6  ;;  %v96_v18 = vrot.slane %v60_v14, %v95_v16  ;;  %p334_p0 = scmp.ne.s32.totalorder %s269_s12, %s333_s3  ;;  %p339_p2 = scmp.lt.s32.totalorder %s333_s3, %s333_s3 }
  0x18   :  { %299 = vmatprep.subr.mxu0 %v81_v44  ;;  %v53_v54 = vrot.slane %v52_v48, 1  ;;  %v47_v55 = vadd.f32 %v46_v49, %v45_v43  ;;  %v40_v57 = vadd.f32 %v39_v51, %v38_v45  ;;  %322 = vmatpush3.msra.mxu1 %v178_v10 }
  0x19   :  { %300 = vmatpush3.msra.mxu0 %v65_v47  ;;  %v56_v62 = vmul.f32 0.33333334, %v33_v52  ;;  %323 = vmatprep.subr.mxu1 %v355_v6  ;;  %p340_p3 = por %p339_p2, %p338_p1 }
  0x1a   :  { %301 = vmatprep.subr.mxu0 %v80_v50  ;;  %v54_v60 = vadd.f32 %v53_v54, %v52_v48  ;;  %v57_v61 = vmul.f32 0.33333334, %v40_v57  ;;  %v58_v63 = vmul.f32 0.33333334, %v47_v55  ;;  %324 = vmatpush3.msra.mxu1 %v177_v12 }
  0x1b   :  { %302 = vmatpush3.msra.mxu0 %v64_v53  ;;  %p341_p4 = pnand %p340_p3, %p334_p0 }
  0x1c   :  { %303 = vmatprep.subr.mxu0 %v79_v56  ;;  %v59_v1 = vmul.f32 0.33333334, %v54_v60  ;;  %v102_v5 = vsel %vm101_vm1, %v58_v63, %v56_v62 }
  0x1d   :  { %304 = vmatpush3.msra.mxu0 %v63_v58 }
  0x1e   :  { %305 = vmatprep.subr.mxu0 %v78_v59  ;;  %v103_v4 = vsel %vm101_vm1, %v59_v1, %v57_v61 }
  0x1f   :  { %306 = vmatpush3.msra.mxu0 %v62_v0  ;;  %170 = vmatprep.mubr.f32.mxu0 %v103_v4 }
  0x20   :  { %307 = vmatprep.subr.mxu0 %v77_v2 }
  0x21   :  { %308 = vmatpush3.msra.mxu0 %v61_v3 }
  0x22   :  { %171 = vmatmul.mubr.f32.vlgmr.msra.gmra.mxu0 %v102_v5 }
  0xe2   :  { %v309_v17 = vpop.f32.mrf.mxu0 }
  0xe4   :  { %v310_v19 = vpop.f32.mrf.mxu0 }
  0xe5   :  { %v311_v20 = vadd.f32 %v310_v19, %v309_v17 }
  0xe7   :  { %v173_v21 = vadd.f32 %v311_v20, %v96_v18 }
  0xe9   :  { %v176_v22 = vmax.f32 %v173_v21, 0.0 }
  0xeb   :  { %326 = vmatmul.mubr.msk.f32.vlgmr.msra.gmra.mxu1 %vm185_vm3, %v176_v22 }
 0x1ab   :  { %v255_v23 = vpop.f32.mrf.mxu1 }
 0x1ac   :  { %v256_v24 = vadd.f32 %v255_v23, %v184_v15 }
 0x1ad   :  { %v327_v25 = vpop.f32.mrf.mxu1 }
 0x1ae   :  { %v259_v26 = vmax.f32 %v256_v24, 0.0 }
 0x1b0   :  { %261 = vst.msk [vmem:[#allocation2] sm:$0x3] %vm260_vm4, %v259_v26 }
 0x1b1   :  { %344 = shalt.err (!%p341_p4)
}
 0x1b2   :  { %271 = dma.vmem_to_hbm [thread:$0]  %s269_s12, 32, %s511_s4, [#allocation3]  }
 0x1b3   :  { %353 = dma.done.wait [#allocation3], 32  }
 0x1b4   :  { %354 = vsyncadd [#allocation3], 4294967264 }
 0x1b5   :  { %275 = vsyncpa [#allocation3], 1 }

</bundles_post_ra>
